<compile_context>
chip_gen: v5e
topology: v5e:2x2
jax: 0.10.0
libtpu: 0.0.40
codegen_flags: <defaults>
</compile_context>

<pallas_src>
import functools

import jax
import jax.numpy as jnp
from jax.experimental import pallas as pl
from jax.experimental.pallas import tpu as pltpu


def _actuator_net_kernel(num_hidden, x_ref, w0t_ref, b0_ref, *rest):
    """Feature-major MLP forward.

    x_ref:   [tb, in_dim]             (batch-major tile straight from HBM)
    w0t_ref: [in_dim, units_p] f32    b0_ref: [units_p, 1] f32
    wh_ref:  [num_hidden, units_p, units_p] bf16
    bh_ref:  [num_hidden, units_p, 1] f32
    wo_ref:  [out_dim, units_p] f32   bo_ref: [out_dim, 1] f32
    out_ref: [out_dim, tb]
    ReLU after every layer except the last.
    """
    if num_hidden > 0:
        wh_ref, bh_ref, wo_ref, bo_ref, out_ref = rest
    else:
        wo_ref, bo_ref, out_ref = rest

    # Layer 0 (tiny K = in_dim): batch-major f32 dot, then one aligned
    # (tb, units_p) -> (units_p, tb) transpose on the (otherwise idle) XLU.
    x = x_ref[...].astype(jnp.float32)                        # [tb, in_dim]
    h_bm = jnp.dot(x, w0t_ref[...].astype(jnp.float32),
                   preferred_element_type=jnp.float32)        # [tb, units_p]
    h = h_bm.T + b0_ref[...]                                  # [units_p, tb]
    h = jnp.maximum(h, 0.0)

    # Hidden layers: bf16 operands into the MXU, f32 accumulate; bias + ReLU
    # in f32 on the VPU.  Static unroll (num_hidden is small and fixed).
    for l in range(num_hidden):
        h = jnp.dot(wh_ref[l], h.astype(jnp.bfloat16),
                    preferred_element_type=jnp.float32) + bh_ref[l]
        h = jnp.maximum(h, 0.0)

    # Output layer (tiny M = out_dim): f32.
    out = jnp.dot(wo_ref[...].astype(jnp.float32), h,
                  preferred_element_type=jnp.float32) + bo_ref[...]
    out_ref[...] = out.astype(out_ref.dtype)                  # [out_dim, tb]


def _round_up(n, m):
    return ((n + m - 1) // m) * m


def actuator_net_forward(x, params, *, batch_tile=8192):
    """ActuatorNet forward pass with a single pallas_call.

    x:      [B, in_dim]  (f32; bf16 also accepted, kernel upcasts)
    params: list of (W, b) in PyTorch nn.Linear layout:
            W [fan_out, fan_in], b [fan_out]
    """
    assert batch_tile % 128 == 0, "batch_tile must be a multiple of 128"
    B, in_dim = x.shape
    num_layers = len(params)
    assert num_layers >= 2, "ActuatorNet has at least an input and output Linear"
    num_hidden = num_layers - 2          # hidden (units -> units) layers
    units = params[0][0].shape[0]
    out_dim = params[-1][0].shape[0]
    units_p = max(_round_up(units, 128), 128)   # pad hidden dim to lane width

    # Lane-dense batch tile; pad batch to a multiple of it.
    tb = min(batch_tile, _round_up(B, 128))
    B_pad = _round_up(B, tb)
    x_pad = jnp.pad(x, ((0, B_pad - B), (0, 0))) if B_pad != B else x

    f32 = jnp.float32
    w0, b0 = params[0]
    wo, bo = params[-1]

    # Layer-0 weight stored transposed [in_dim, units_p] so the kernel's first
    # dot is batch-major (no host transpose of x).  Zero-pad units -> units_p:
    # padded rows of h are exactly 0 after bias+ReLU, so results are unchanged.
    w0t = jnp.zeros((in_dim, units_p), f32).at[:, :units].set(w0.astype(f32).T)
    b0c = jnp.zeros((units_p, 1), f32).at[:units, 0].set(b0.astype(f32))
    wo_p = jnp.zeros((out_dim, units_p), f32).at[:, :units].set(wo.astype(f32))
    bo_c = bo.astype(f32).reshape(out_dim, 1)

    flat_args = [x_pad, w0t, b0c]
    in_specs = [
        pl.BlockSpec((tb, in_dim), lambda i: (i, 0)),
        pl.BlockSpec(w0t.shape, lambda i: (0, 0)),
        pl.BlockSpec(b0c.shape, lambda i: (0, 0)),
    ]
    if num_hidden > 0:
        wh = jnp.stack([
            jnp.zeros((units_p, units_p), f32)
            .at[:units, :units].set(params[l][0].astype(f32))
            for l in range(1, num_layers - 1)
        ]).astype(jnp.bfloat16)                       # bf16 -> half the DMA, 2-3x MXU
        bh = jnp.stack([
            jnp.zeros((units_p, 1), f32).at[:units, 0].set(params[l][1].astype(f32))
            for l in range(1, num_layers - 1)
        ])                                            # biases stay f32 (VPU add)
        flat_args += [wh, bh]
        in_specs += [pl.BlockSpec(wh.shape, lambda i: (0, 0, 0)),
                     pl.BlockSpec(bh.shape, lambda i: (0, 0, 0))]
    flat_args += [wo_p, bo_c]
    in_specs += [pl.BlockSpec(wo_p.shape, lambda i: (0, 0)),
                 pl.BlockSpec(bo_c.shape, lambda i: (0, 0))]

    # Advisory cost estimate: tiny flops, mem-bound on x traffic.
    dims = [in_dim] + [units_p] * (num_hidden + 1) + [out_dim]
    flops = sum(2 * B_pad * dims[l] * dims[l + 1] for l in range(num_layers))
    param_bytes = sum(int(a.size) * a.dtype.itemsize for a in flat_args[1:])
    bytes_accessed = (int(x_pad.size) * x_pad.dtype.itemsize
                      + B_pad * out_dim * x.dtype.itemsize
                      + param_bytes)

    # Explicit VMEM budget (v7x: 64 MiB physical / 32 MiB scoped default).
    # The (tb, in_dim) input tile is lane-padded to 128 in VMEM, so account
    # for that; intermediates are [units_p, tb] f32/bf16 tensors.
    x_tile_vmem = tb * _round_up(in_dim, 128) * 4
    out_tile_vmem = _round_up(out_dim, 8) * tb * 4
    h_vmem = units_p * tb * 4
    vmem_need = 2 * (x_tile_vmem + out_tile_vmem + param_bytes) + 8 * h_vmem
    vmem_limit = int(min(max(vmem_need, 32 * 1024 * 1024), 100 * 1024 * 1024))

    out_t = pl.pallas_call(
        functools.partial(_actuator_net_kernel, num_hidden),
        out_shape=jax.ShapeDtypeStruct((out_dim, B_pad), x.dtype),
        grid_spec=pltpu.PrefetchScalarGridSpec(
            num_scalar_prefetch=0,
            grid=(B_pad // tb,),
            in_specs=in_specs,
            out_specs=pl.BlockSpec((out_dim, tb), lambda i: (0, i)),
        ),
        compiler_params=pltpu.CompilerParams(
            dimension_semantics=("parallel",),      # batch axis shards across TCs
            vmem_limit_bytes=vmem_limit),
        cost_estimate=pl.CostEstimate(
            flops=flops, transcendentals=0, bytes_accessed=bytes_accessed),
    )(*flat_args)

    # out_dim == 1 makes this transpose effectively a reshape; for larger
    # out_dim the kernel should emit a batch-major output tile instead.
    return out_t.T[:B]


def init_actuator_net_params(key, in_dim, units=100, layers=4, out_dim=1):
    """Parameters matching ActuatorNet's layer structure (torch layout):

        Linear(in_dim, units) + ReLU
        (layers - 1) x [Linear(units, units) + ReLU]
        Linear(units, out_dim)
    """
    dims = [in_dim] + [units] * layers + [out_dim]
    params = []
    for l in range(len(dims) - 1):
        key, kw, kb = jax.random.split(key, 3)
        fan_in, fan_out = dims[l], dims[l + 1]
        bound = 1.0 / (fan_in ** 0.5)  # torch.nn.Linear default init range
        w = jax.random.uniform(kw, (fan_out, fan_in), jnp.float32, -bound, bound)
        b = jax.random.uniform(kb, (fan_out,), jnp.float32, -bound, bound)
        params.append((w, b))
    return params


def actuator_net_reference(x, params):
    """Pure-JAX f32 reference (PyTorch semantics: x @ W.T + b, ReLU between)."""
    h = x
    for l, (w, b) in enumerate(params):
        h = h @ w.T + b
        if l < len(params) - 1:
            h = jnp.maximum(h, 0.0)
    return h


if __name__ == "__main__":
    key = jax.random.PRNGKey(0)
    k_params, k_x1, k_x2 = jax.random.split(key, 3)

    # Small shapes consistent with ActuatorNet(in_dim=6, units=32, layers=4, out_dim=1)
    batch, in_dim, units, layers, out_dim = 8, 6, 32, 4, 1

    params = init_actuator_net_params(k_params, in_dim, units=units,
                                      layers=layers, out_dim=out_dim)

    # bf16 hidden-layer matmuls (f32 accumulate) -> looser tolerance vs f32 ref.
    ATOL = RTOL = 3e-2

    # Test 1: tiny batch (padded to one 128-lane tile, grid=1).
    x1 = jax.random.normal(k_x1, (batch, in_dim), jnp.float32)
    out1 = jax.block_until_ready(actuator_net_forward(x1, params))
    ref1 = actuator_net_reference(x1, params)
    assert out1.shape == (batch, out_dim)
    assert jnp.allclose(out1, ref1, atol=ATOL, rtol=RTOL)

    # Test 2: non-multiple batch with multiple grid steps (padding + grid>1).
    x2 = jax.random.normal(k_x2, (300, in_dim), jnp.float32)
    out2 = jax.block_until_ready(
        actuator_net_forward(x2, params, batch_tile=128))
    ref2 = actuator_net_reference(x2, params)
    assert out2.shape == (300, out_dim)
    assert jnp.allclose(out2, ref2, atol=ATOL, rtol=RTOL)

    print("KERNEL_OK")
</pallas_src>

<mosaic_0001>
module attributes {stable_mosaic.version = 11 : i64} {
  func.func @_actuator_net_kernel(%arg0: i32, %arg1: memref<128x6xf32, #tpu.memory_space<vmem>>, %arg2: memref<6x128xf32, #tpu.memory_space<vmem>>, %arg3: memref<128x1xf32, #tpu.memory_space<vmem>>, %arg4: memref<3x128x128xbf16, #tpu.memory_space<vmem>>, %arg5: memref<3x128x1xf32, #tpu.memory_space<vmem>>, %arg6: memref<1x128xf32, #tpu.memory_space<vmem>>, %arg7: memref<1x1xf32, #tpu.memory_space<vmem>>, %arg8: memref<1x128xf32, #tpu.memory_space<vmem>>) attributes {dimension_semantics = [#tpu.dimension_semantics<parallel>], iteration_bounds = array<i64: 1>, scalar_prefetch = 0 : i64, scratch_operands = 0 : i64, tpu.core_type = #tpu.core_type<tc>, window_params = [{transform_indices = @transform_0, window_bounds = array<i64: 128, 6>}, {pipeline_mode = #tpu.pipeline_mode<synchronous>, transform_indices = @transform_1, window_bounds = array<i64: 6, 128>}, {pipeline_mode = #tpu.pipeline_mode<synchronous>, transform_indices = @transform_2, window_bounds = array<i64: 128, 1>}, {pipeline_mode = #tpu.pipeline_mode<synchronous>, transform_indices = @transform_3, window_bounds = array<i64: 3, 128, 128>}, {pipeline_mode = #tpu.pipeline_mode<synchronous>, transform_indices = @transform_4, window_bounds = array<i64: 3, 128, 1>}, {pipeline_mode = #tpu.pipeline_mode<synchronous>, transform_indices = @transform_5, window_bounds = array<i64: 1, 128>}, {pipeline_mode = #tpu.pipeline_mode<synchronous>, transform_indices = @transform_6, window_bounds = array<i64: 1, 1>}, {transform_indices = @transform_7, window_bounds = array<i64: 1, 128>}]} {
    %c0 = arith.constant 0 : index
    %c0_0 = arith.constant 0 : index
    %0 = vector.load %arg1[%c0, %c0_0] : memref<128x6xf32, #tpu.memory_space<vmem>>, vector<128x6xf32>
    %c0_1 = arith.constant 0 : index
    %c0_2 = arith.constant 0 : index
    %1 = vector.load %arg2[%c0_1, %c0_2] : memref<6x128xf32, #tpu.memory_space<vmem>>, vector<6x128xf32>
    %cst = arith.constant dense<0.000000e+00> : vector<128x128xf32>
    %2 = tpu.matmul %0, %1, %cst {dimension_numbers = #tpu.dot_dimension_numbers<[1], [0], [0], [1], [0, 0, 1, 1], [], []>} : vector<128x6xf32>, vector<6x128xf32>, vector<128x128xf32> -> vector<128x128xf32>
    %3 = tpu.transpose %2, [1, 0] : vector<128x128xf32> -> vector<128x128xf32>
    %c0_3 = arith.constant 0 : index
    %c0_4 = arith.constant 0 : index
    %4 = vector.load %arg3[%c0_3, %c0_4] : memref<128x1xf32, #tpu.memory_space<vmem>>, vector<128x1xf32>
    %5 = vector.broadcast %4 : vector<128x1xf32> to vector<128x128xf32>
    %6 = arith.addf %3, %5 : vector<128x128xf32>
    %cst_5 = arith.constant 0.000000e+00 : f32
    %7 = vector.broadcast %cst_5 : f32 to vector<128x128xf32>
    %8 = arith.maximumf %6, %7 : vector<128x128xf32>
    %c0_6 = arith.constant 0 : index
    %c0_7 = arith.constant 0 : index
    %c0_8 = arith.constant 0 : index
    %9 = vector.load %arg4[%c0_6, %c0_7, %c0_8] : memref<3x128x128xbf16, #tpu.memory_space<vmem>>, vector<1x128x128xbf16>
    %10 = vector.shape_cast %9 : vector<1x128x128xbf16> to vector<128x128xbf16>
    %11 = arith.truncf %8 : vector<128x128xf32> to vector<128x128xbf16>
    %cst_9 = arith.constant dense<0.000000e+00> : vector<128x128xf32>
    %12 = tpu.matmul %10, %11, %cst_9 {dimension_numbers = #tpu.dot_dimension_numbers<[1], [0], [0], [1], [0, 0, 1, 1], [], []>} : vector<128x128xbf16>, vector<128x128xbf16>, vector<128x128xf32> -> vector<128x128xf32>
    %c0_10 = arith.constant 0 : index
    %c0_11 = arith.constant 0 : index
    %c0_12 = arith.constant 0 : index
    %13 = vector.load %arg5[%c0_10, %c0_11, %c0_12] : memref<3x128x1xf32, #tpu.memory_space<vmem>>, vector<1x128x1xf32>
    %14 = vector.shape_cast %13 : vector<1x128x1xf32> to vector<128x1xf32>
    %15 = vector.broadcast %14 : vector<128x1xf32> to vector<128x128xf32>
    %16 = arith.addf %12, %15 : vector<128x128xf32>
    %cst_13 = arith.constant 0.000000e+00 : f32
    %17 = vector.broadcast %cst_13 : f32 to vector<128x128xf32>
    %18 = arith.maximumf %16, %17 : vector<128x128xf32>
    %c1 = arith.constant 1 : index
    %c0_14 = arith.constant 0 : index
    %c0_15 = arith.constant 0 : index
    %19 = vector.load %arg4[%c1, %c0_14, %c0_15] : memref<3x128x128xbf16, #tpu.memory_space<vmem>>, vector<1x128x128xbf16>
    %20 = vector.shape_cast %19 : vector<1x128x128xbf16> to vector<128x128xbf16>
    %21 = arith.truncf %18 : vector<128x128xf32> to vector<128x128xbf16>
    %cst_16 = arith.constant dense<0.000000e+00> : vector<128x128xf32>
    %22 = tpu.matmul %20, %21, %cst_16 {dimension_numbers = #tpu.dot_dimension_numbers<[1], [0], [0], [1], [0, 0, 1, 1], [], []>} : vector<128x128xbf16>, vector<128x128xbf16>, vector<128x128xf32> -> vector<128x128xf32>
    %c1_17 = arith.constant 1 : index
    %c0_18 = arith.constant 0 : index
    %c0_19 = arith.constant 0 : index
    %23 = vector.load %arg5[%c1_17, %c0_18, %c0_19] : memref<3x128x1xf32, #tpu.memory_space<vmem>>, vector<1x128x1xf32>
    %24 = vector.shape_cast %23 : vector<1x128x1xf32> to vector<128x1xf32>
    %25 = vector.broadcast %24 : vector<128x1xf32> to vector<128x128xf32>
    %26 = arith.addf %22, %25 : vector<128x128xf32>
    %cst_20 = arith.constant 0.000000e+00 : f32
    %27 = vector.broadcast %cst_20 : f32 to vector<128x128xf32>
    %28 = arith.maximumf %26, %27 : vector<128x128xf32>
    %c2 = arith.constant 2 : index
    %c0_21 = arith.constant 0 : index
    %c0_22 = arith.constant 0 : index
    %29 = vector.load %arg4[%c2, %c0_21, %c0_22] : memref<3x128x128xbf16, #tpu.memory_space<vmem>>, vector<1x128x128xbf16>
    %30 = vector.shape_cast %29 : vector<1x128x128xbf16> to vector<128x128xbf16>
    %31 = arith.truncf %28 : vector<128x128xf32> to vector<128x128xbf16>
    %cst_23 = arith.constant dense<0.000000e+00> : vector<128x128xf32>
    %32 = tpu.matmul %30, %31, %cst_23 {dimension_numbers = #tpu.dot_dimension_numbers<[1], [0], [0], [1], [0, 0, 1, 1], [], []>} : vector<128x128xbf16>, vector<128x128xbf16>, vector<128x128xf32> -> vector<128x128xf32>
    %c2_24 = arith.constant 2 : index
    %c0_25 = arith.constant 0 : index
    %c0_26 = arith.constant 0 : index
    %33 = vector.load %arg5[%c2_24, %c0_25, %c0_26] : memref<3x128x1xf32, #tpu.memory_space<vmem>>, vector<1x128x1xf32>
    %34 = vector.shape_cast %33 : vector<1x128x1xf32> to vector<128x1xf32>
    %35 = vector.broadcast %34 : vector<128x1xf32> to vector<128x128xf32>
    %36 = arith.addf %32, %35 : vector<128x128xf32>
    %cst_27 = arith.constant 0.000000e+00 : f32
    %37 = vector.broadcast %cst_27 : f32 to vector<128x128xf32>
    %38 = arith.maximumf %36, %37 : vector<128x128xf32>
    %c0_28 = arith.constant 0 : index
    %c0_29 = arith.constant 0 : index
    %39 = vector.load %arg6[%c0_28, %c0_29] : memref<1x128xf32, #tpu.memory_space<vmem>>, vector<1x128xf32>
    %cst_30 = arith.constant dense<0.000000e+00> : vector<1x128xf32>
    %40 = tpu.matmul %39, %38, %cst_30 {dimension_numbers = #tpu.dot_dimension_numbers<[1], [0], [0], [1], [0, 0, 1, 1], [], []>} : vector<1x128xf32>, vector<128x128xf32>, vector<1x128xf32> -> vector<1x128xf32>
    %c0_31 = arith.constant 0 : index
    %c0_32 = arith.constant 0 : index
    %41 = vector.load %arg7[%c0_31, %c0_32] : memref<1x1xf32, #tpu.memory_space<vmem>>, vector<1x1xf32>
    %42 = vector.broadcast %41 : vector<1x1xf32> to vector<1x128xf32>
    %43 = arith.addf %40, %42 : vector<1x128xf32>
    %c0_33 = arith.constant 0 : index
    %c0_34 = arith.constant 0 : index
    %44 = vector.load %arg8[%c0_33, %c0_34] : memref<1x128xf32, #tpu.memory_space<vmem>>, vector<1x128xf32>
    tpu.vector_store %arg8[%c0_33, %c0_34], %43 {strides = array<i32>} : memref<1x128xf32, #tpu.memory_space<vmem>>, vector<1x128xf32>,
    return
  }
  func.func @transform_0(%arg0: i32) -> (i32, i32) {
    %c0_i32 = arith.constant 0 : i32
    %c0_i32_0 = arith.constant 0 : i32
    return %arg0, %c0_i32 : i32, i32
  }
  func.func @transform_1(%arg0: i32) -> (i32, i32) {
    %c0_i32 = arith.constant 0 : i32
    %c0_i32_0 = arith.constant 0 : i32
    %c0_i32_1 = arith.constant 0 : i32
    return %c0_i32, %c0_i32_0 : i32, i32
  }
  func.func @transform_2(%arg0: i32) -> (i32, i32) {
    %c0_i32 = arith.constant 0 : i32
    %c0_i32_0 = arith.constant 0 : i32
    %c0_i32_1 = arith.constant 0 : i32
    return %c0_i32, %c0_i32_0 : i32, i32
  }
  func.func @transform_3(%arg0: i32) -> (i32, i32, i32) {
    %c0_i32 = arith.constant 0 : i32
    %c0_i32_0 = arith.constant 0 : i32
    %c0_i32_1 = arith.constant 0 : i32
    %c0_i32_2 = arith.constant 0 : i32
    return %c0_i32, %c0_i32_0, %c0_i32_1 : i32, i32, i32
  }
  func.func @transform_4(%arg0: i32) -> (i32, i32, i32) {
    %c0_i32 = arith.constant 0 : i32
    %c0_i32_0 = arith.constant 0 : i32
    %c0_i32_1 = arith.constant 0 : i32
    %c0_i32_2 = arith.constant 0 : i32
    return %c0_i32, %c0_i32_0, %c0_i32_1 : i32, i32, i32
  }
  func.func @transform_5(%arg0: i32) -> (i32, i32) {
    %c0_i32 = arith.constant 0 : i32
    %c0_i32_0 = arith.constant 0 : i32
    %c0_i32_1 = arith.constant 0 : i32
    return %c0_i32, %c0_i32_0 : i32, i32
  }
  func.func @transform_6(%arg0: i32) -> (i32, i32) {
    %c0_i32 = arith.constant 0 : i32
    %c0_i32_0 = arith.constant 0 : i32
    %c0_i32_1 = arith.constant 0 : i32
    return %c0_i32, %c0_i32_0 : i32, i32
  }
  func.func @transform_7(%arg0: i32) -> (i32, i32) {
    %c0_i32 = arith.constant 0 : i32
    %c0_i32_0 = arith.constant 0 : i32
    return %c0_i32, %arg0 : i32, i32
  }
}

</mosaic_0001>

<bundles_post_ra>
// kernel: tpu_custom_call.1
= control target key start
LH: loop header
LB: loop body
LE: loop exit
PB: predicated region body
PF: predicated region fallthrough
CT: control target
= control target key end

     0   :  { %s1725_s0 = inlined_call_operand.vmem [shape: f32[128,6], index: 0, kind: input, shape index: {}]   ;;  %s1726_s1 = inlined_call_operand.vmem [shape: f32[6,128], index: 1, kind: input, shape index: {}]   ;;  %s1727_s2 = inlined_call_operand.vmem [shape: f32[128,1], index: 2, kind: input, shape index: {}]   ;;  %s1728_s3 = inlined_call_operand.vmem [shape: bf16[3,128,128], index: 3, kind: input, shape index: {}]   ;;  %s1729_s4 = inlined_call_operand.vmem [shape: f32[3,128,1], index: 4, kind: input, shape index: {}]   ;;  %s1730_s5 = inlined_call_operand.vmem [shape: f32[1,128], index: 5, kind: input, shape index: {}]   ;;  %s1731_s6 = inlined_call_operand.<no memory space> [shape: f32[1,1], index: 6, kind: input, shape index: {}]   ;;  %s1732_s7 = inlined_call_operand.hbm [shape: f32[1,128], index: 7, kind: output, shape index: {}]  }
   0x1   :  { %v12_v0 = vstv %s1731_s6 }
   0x2   :  { %13 = vst [vmem:[#allocation2] sm:$0x1] %v12_v0 }
   0x3   :  { %v45_v1 = vld [vmem:[%s1726_s1] sm:$0x3f]  ;;  %vm95_vm0 = vcmask 1045504   ;;  %vm46_vm1 = vcmask 48128   ;;  %v210_v3 = vld [vmem:[%s1727_s2 + $0x70] sm:$0xff]  ;;  %v1304_v4 = vmov 0  }
   0x4   :  { %v29_v2 = vld [vmem:[%s1725_s0] sm:$0xff]  ;;  %1072 = vmatpush.msk.msra.mxu0 %vm95_vm0, %v45_v1  ;;  %1275 = vset.pattern.permute.xlu1 %v1304_v4 }
   0x5   :  { %1073 = vmatmul.msk.f32.vlgmr.msra.gmra.mxu0 %vm46_vm1, %v29_v2  ;;  %284 = vperm.xlu1 %1275, %v210_v3  }
   0x6   :  { %1276 = vset.pattern.permute.xlu2 %v1304_v4 }
   0x7   :  { %14 = vsyncpa [#allocation4], 0  ;;  %v30_v5 = vld [vmem:[%s1725_s0 + $0x8] sm:$0xff]  ;;  %v211_v6 = vld [vmem:[%s1727_s2 + $0x78] sm:$0xff]  ;;  %s1305_s25 = smov [#allocation3]   ;;  %s1063_s29 = sshll.u32 %s1732_s7, 4  ;;  %s1064_s29 = int_to_ptr.hbm [resolvable:$true] %s1063_s29 }
   0x8   :  { %v31_v7 = vld [vmem:[%s1725_s0 + $0x10] sm:$0xff]  ;;  %v208_v9 = vld [vmem:[%s1727_s2 + $0x60] sm:$0xff]  ;;  %v32_v10 = vld [vmem:[%s1725_s0 + $0x18] sm:$0xff]  ;;  %s1061_s26 = sshll.u32 %s1305_s25, 4  ;;  %s1062_s26 = int_to_ptr.vmem [resolvable:$true] %s1061_s26 }
   0x9   :  { %v206_v8 = vld [vmem:[%s1727_s2 + $0x50] sm:$0xff]  ;;  %274 = vperm.xlu2 %1276, %v208_v9   ;;  %v204_v11 = vld [vmem:[%s1727_s2 + $0x40] sm:$0xff]  ;;  %v209_v12 = vld [vmem:[%s1727_s2 + $0x68] sm:$0xff] }
   0xa   :  { %v33_v13 = vld [vmem:[%s1725_s0 + $0x20] sm:$0xff]  ;;  %v202_v14 = vld [vmem:[%s1727_s2 + $0x30] sm:$0xff]  ;;  %v207_v15 = vld [vmem:[%s1727_s2 + $0x58] sm:$0xff] }
   0xb   :  { %v34_v16 = vld [vmem:[%s1725_s0 + $0x28] sm:$0xff]  ;;  %v200_v17 = vld [vmem:[%s1727_s2 + $0x20] sm:$0xff]  ;;  %v35_v19 = vld [vmem:[%s1725_s0 + $0x30] sm:$0xff] }
   0xc   :  { %v205_v18 = vld [vmem:[%s1727_s2 + $0x48] sm:$0xff]  ;;  %v198_v20 = vld [vmem:[%s1727_s2 + $0x10] sm:$0xff]  ;;  %v203_v21 = vld [vmem:[%s1727_s2 + $0x38] sm:$0xff] }
   0xd   :  { %1074 = vmatmul.msk.f32.gmra.mxu0 %vm46_vm1, %v30_v5  ;;  %289 = vperm.xlu1 %1275, %v211_v6   ;;  %v36_v22 = vld [vmem:[%s1725_s0 + $0x38] sm:$0xff]  ;;  %v196_v23 = vld [vmem:[%s1727_s2] sm:$0xff]  ;;  %v201_v24 = vld [vmem:[%s1727_s2 + $0x28] sm:$0xff] }
   0xe   :  { %v37_v25 = vld [vmem:[%s1725_s0 + $0x40] sm:$0xff]  ;;  %v362_v26 = vld [vmem:[%s1729_s4 + $0x70] sm:$0xff]  ;;  %v199_v27 = vld [vmem:[%s1727_s2 + $0x18] sm:$0xff] }
   0xf   :  { %v38_v28 = vld [vmem:[%s1725_s0 + $0x48] sm:$0xff]  ;;  %v360_v29 = vld [vmem:[%s1729_s4 + $0x60] sm:$0xff]  ;;  %v39_v31 = vld [vmem:[%s1725_s0 + $0x50] sm:$0xff] }
  0x10   :  { %v197_v30 = vld [vmem:[%s1727_s2 + $0x8] sm:$0xff]  ;;  %v358_v32 = vld [vmem:[%s1729_s4 + $0x50] sm:$0xff]  ;;  %v363_v33 = vld [vmem:[%s1729_s4 + $0x78] sm:$0xff] }
  0x11   :  { %279 = vperm.xlu2 %1276, %v209_v12   ;;  %v40_v34 = vld [vmem:[%s1725_s0 + $0x58] sm:$0xff]  ;;  %v356_v35 = vld [vmem:[%s1729_s4 + $0x40] sm:$0xff]  ;;  %v361_v36 = vld [vmem:[%s1729_s4 + $0x68] sm:$0xff] }
  0x12   :  { %v41_v37 = vld [vmem:[%s1725_s0 + $0x60] sm:$0xff]  ;;  %v354_v38 = vld [vmem:[%s1729_s4 + $0x30] sm:$0xff]  ;;  %v359_v39 = vld [vmem:[%s1729_s4 + $0x58] sm:$0xff] }
  0x13   :  { %v42_v40 = vld [vmem:[%s1725_s0 + $0x68] sm:$0xff]  ;;  %v352_v41 = vld [vmem:[%s1729_s4 + $0x20] sm:$0xff]  ;;  %v43_v43 = vld [vmem:[%s1725_s0 + $0x70] sm:$0xff] }
  0x14   :  { %v357_v42 = vld [vmem:[%s1729_s4 + $0x48] sm:$0xff]  ;;  %v350_v44 = vld [vmem:[%s1729_s4 + $0x10] sm:$0xff]  ;;  %v355_v45 = vld [vmem:[%s1729_s4 + $0x38] sm:$0xff] }
  0x15   :  { %1075 = vmatmul.msk.f32.gmra.mxu0 %vm46_vm1, %v31_v7  ;;  %264 = vperm.xlu1 %1275, %v206_v8   ;;  %v44_v46 = vld [vmem:[%s1725_s0 + $0x78] sm:$0xff]  ;;  %v348_v47 = vld [vmem:[%s1729_s4] sm:$0xff]  ;;  %v353_v48 = vld [vmem:[%s1729_s4 + $0x28] sm:$0xff] }
  0x16   :  { %v1152_v50 = vld [vmem:[%s1729_s4 + $0xf8] sm:$0xff]  ;;  %v1150_v53 = vld [vmem:[%s1729_s4 + $0xe8] sm:$0xff]  ;;  %v1149_v57 = vld [vmem:[%s1729_s4 + $0xe0] sm:$0xff] }
  0x17   :  { %v351_v51 = vld [vmem:[%s1729_s4 + $0x18] sm:$0xff]  ;;  %v349_v54 = vld [vmem:[%s1729_s4 + $0x8] sm:$0xff]  ;;  %v1147_v60 = vld [vmem:[%s1729_s4 + $0xd0] sm:$0xff] }
  0x18   :  { %v1148_v56 = vld [vmem:[%s1729_s4 + $0xd8] sm:$0xff]  ;;  %v1146_v59 = vld [vmem:[%s1729_s4 + $0xc8] sm:$0xff]  ;;  %v1145_v63 = vld [vmem:[%s1729_s4 + $0xc0] sm:$0xff] }
  0x19   :  { %269 = vperm.xlu2 %1276, %v207_v15   ;;  %v1144_v62 = vld [vmem:[%s1729_s4 + $0xb8] sm:$0xff]  ;;  %v1142_v1 = vld [vmem:[%s1729_s4 + $0xa8] sm:$0xff]  ;;  %v1143_v2 = vld [vmem:[%s1729_s4 + $0xb0] sm:$0xff] }
  0x1a   :  { %v1140_v5 = vld [vmem:[%s1729_s4 + $0x98] sm:$0xff]  ;;  %v1141_v6 = vld [vmem:[%s1729_s4 + $0xa0] sm:$0xff]  ;;  %v1138_v8 = vld [vmem:[%s1729_s4 + $0x88] sm:$0xff] }
  0x1b   :  { %v1139_v9 = vld [vmem:[%s1729_s4 + $0x90] sm:$0xff]  ;;  %v1137_v12 = vld [vmem:[%s1729_s4 + $0x80] sm:$0xff]  ;;  %v1216_v15 = vld [vmem:[%s1729_s4 + $0x178] sm:$0xff] }
  0x1d   :  { %1076 = vmatmul.msk.f32.gmra.mxu0 %vm46_vm1, %v32_v10  ;;  %254 = vperm.xlu1 %1275, %v204_v11   ;;  %v1215_v11 = vld [vmem:[%s1729_s4 + $0x170] sm:$0xff] }
  0x21   :  { %259 = vperm.xlu2 %1276, %v205_v18   ;;  %v1214_v18 = vld [vmem:[%s1729_s4 + $0x168] sm:$0xff] }
  0x25   :  { %1077 = vmatmul.msk.f32.gmra.mxu0 %vm46_vm1, %v33_v13  ;;  %244 = vperm.xlu1 %1275, %v202_v14   ;;  %v1213_v14 = vld [vmem:[%s1729_s4 + $0x160] sm:$0xff] }
  0x29   :  { %249 = vperm.xlu2 %1276, %v203_v21   ;;  %v1212_v21 = vld [vmem:[%s1729_s4 + $0x158] sm:$0xff] }
  0x2d   :  { %1078 = vmatmul.msk.f32.gmra.mxu0 %vm46_vm1, %v34_v16  ;;  %234 = vperm.xlu1 %1275, %v200_v17   ;;  %v1211_v17 = vld [vmem:[%s1729_s4 + $0x150] sm:$0xff] }
  0x31   :  { %239 = vperm.xlu2 %1276, %v201_v24   ;;  %v1210_v24 = vld [vmem:[%s1729_s4 + $0x148] sm:$0xff] }
  0x35   :  { %1079 = vmatmul.msk.f32.gmra.mxu0 %vm46_vm1, %v35_v19  ;;  %224 = vperm.xlu1 %1275, %v198_v20   ;;  %v1209_v20 = vld [vmem:[%s1729_s4 + $0x140] sm:$0xff] }
  0x39   :  { %229 = vperm.xlu2 %1276, %v199_v27  }
  0x3d   :  { %1080 = vmatmul.msk.f32.gmra.mxu0 %vm46_vm1, %v36_v22  ;;  %214 = vperm.xlu1 %1275, %v196_v23   ;;  %v1207_v23 = vld [vmem:[%s1729_s4 + $0x130] sm:$0xff] }
  0x41   :  { %219 = vperm.xlu2 %1276, %v197_v30  }
  0x45   :  { %1081 = vmatmul.msk.f32.gmra.mxu0 %vm46_vm1, %v37_v25  ;;  %436 = vperm.xlu1 %1275, %v362_v26  }
  0x49   :  { %441 = vperm.xlu2 %1276, %v363_v33   ;;  %v1202_v33 = vld [vmem:[%s1729_s4 + $0x108] sm:$0xff] }
  0x4d   :  { %1082 = vmatmul.msk.f32.gmra.mxu0 %vm46_vm1, %v38_v28  ;;  %426 = vperm.xlu1 %1275, %v360_v29   ;;  %v1205_v28 = vld [vmem:[%s1729_s4 + $0x120] sm:$0xff]  ;;  %v1208_v29 = vld [vmem:[%s1729_s4 + $0x138] sm:$0xff] }
  0x51   :  { %431 = vperm.xlu2 %1276, %v361_v36  }
  0x55   :  { %1083 = vmatmul.msk.f32.gmra.mxu0 %vm46_vm1, %v39_v31  ;;  %416 = vperm.xlu1 %1275, %v358_v32  }
  0x59   :  { %421 = vperm.xlu2 %1276, %v359_v39  }
  0x5d   :  { %1084 = vmatmul.msk.f32.gmra.mxu0 %vm46_vm1, %v40_v34  ;;  %406 = vperm.xlu1 %1275, %v356_v35   ;;  %v1206_v34 = vld [vmem:[%s1729_s4 + $0x128] sm:$0xff] }
  0x61   :  { %411 = vperm.xlu2 %1276, %v357_v42  }
  0x63   :  { %v1588_v26 = vpop.permute.xlu2 %274 }
  0x65   :  { %1085 = vmatmul.msk.f32.gmra.mxu0 %vm46_vm1, %v41_v37  ;;  %396 = vperm.xlu1 %1275, %v354_v38   ;;  %v1204_v37 = vld [vmem:[%s1729_s4 + $0x118] sm:$0xff] }
  0x69   :  { %401 = vperm.xlu2 %1276, %v355_v45  }
  0x6b   :  { %v280_v32 = vpop.permute.xlu2 %279 }
  0x6d   :  { %1086 = vmatmul.msk.f32.gmra.mxu0 %vm46_vm1, %v42_v40  ;;  %386 = vperm.xlu1 %1275, %v352_v41   ;;  %v1201_v41 = vld [vmem:[%s1729_s4 + $0x100] sm:$0xff] }
  0x71   :  { %391 = vperm.xlu2 %1276, %v353_v48  }
  0x73   :  { %v270_v38 = vpop.permute.xlu2 %269 }
  0x75   :  { %1087 = vmatmul.msk.f32.gmra.mxu0 %vm46_vm1, %v43_v43  ;;  %376 = vperm.xlu1 %1275, %v350_v44  }
  0x77   :  { %v1586_v25 = vpop.permute.xlu1 %284 }
  0x79   :  { %381 = vperm.xlu2 %1276, %v351_v51  }
  0x7b   :  { %v260_v40 = vpop.permute.xlu2 %259 }
  0x7d   :  { %1088 = vmatmul.msk.f32.gmra.mxu0 %vm46_vm1, %v44_v46  ;;  %366 = vperm.xlu1 %1275, %v348_v47  }
  0x7f   :  { %v1596_v30 = vpop.permute.xlu1 %289 }
  0x81   :  { %371 = vperm.xlu2 %1276, %v349_v54  }
  0x82   :  { %v116_v49 = vpop.f32.mrf.mxu0 }
  0x83   :  { %164 = vxpose.xlu0.b32.start [1/16] %v116_v49, 128  ;;  %v250_v43 = vpop.permute.xlu2 %249 }
  0x85   :  { %676 = vperm.xlu1 %1275, %v1152_v50  }
  0x87   :  { %v1604_v36 = vpop.permute.xlu1 %264 }
  0x89   :  { %661 = vperm.xlu2 %1276, %v1149_v57  }
  0x8a   :  { %v119_v52 = vpop.f32.mrf.mxu0 }
  0x8b   :  { %165 = vxpose.xlu0.b32.cont [2/16] %v119_v52, 128  ;;  %v240_v45 = vpop.permute.xlu2 %239 }
  0x8d   :  { %666 = vperm.xlu1 %1275, %v1150_v53  }
  0x8f   :  { %v1609_v39 = vpop.permute.xlu1 %254 }
  0x91   :  { %651 = vperm.xlu2 %1276, %v1147_v60  }
  0x92   :  { %v122_v55 = vpop.f32.mrf.mxu0 }
  0x93   :  { %166 = vxpose.xlu0.b32.cont [3/16] %v122_v55, 128  ;;  %v230_v47 = vpop.permute.xlu2 %229 }
  0x95   :  { %656 = vperm.xlu1 %1275, %v1148_v56  }
  0x97   :  { %v245_v42 = vpop.permute.xlu1 %244 }
  0x99   :  { %641 = vperm.xlu2 %1276, %v1145_v63  }
  0x9a   :  { %v125_v58 = vpop.f32.mrf.mxu0 }
  0x9b   :  { %167 = vxpose.xlu0.b32.cont [4/16] %v125_v58, 128  ;;  %v220_v51 = vpop.permute.xlu2 %219 }
  0x9d   :  { %646 = vperm.xlu1 %1275, %v1146_v59  }
  0x9f   :  { %v235_v44 = vpop.permute.xlu1 %234 }
  0xa1   :  { %631 = vperm.xlu2 %1276, %v1143_v2  }
  0xa2   :  { %v128_v61 = vpop.f32.mrf.mxu0 }
  0xa3   :  { %168 = vxpose.xlu0.b32.cont [5/16] %v128_v61, 128 }
  0xa5   :  { %636 = vperm.xlu1 %1275, %v1144_v62  }
  0xa7   :  { %v225_v46 = vpop.permute.xlu1 %224 }
  0xa9   :  { %621 = vperm.xlu2 %1276, %v1141_v6  }
  0xaa   :  { %v131_v0 = vpop.f32.mrf.mxu0 }
  0xab   :  { %169 = vxpose.xlu0.b32.cont [6/16] %v131_v0, 128 }
  0xad   :  { %626 = vperm.xlu1 %1275, %v1142_v1  }
  0xaf   :  { %v215_v49 = vpop.permute.xlu1 %214 }
  0xb1   :  { %611 = vperm.xlu2 %1276, %v1139_v9  }
  0xb2   :  { %v134_v3 = vpop.f32.mrf.mxu0 }
  0xb3   :  { %170 = vxpose.xlu0.b32.cont [7/16] %v134_v3, 128 }
  0xb5   :  { %616 = vperm.xlu1 %1275, %v1140_v5  }
  0xb9   :  { %601 = vperm.xlu2 %1276, %v1137_v12  }
  0xba   :  { %v137_v7 = vpop.f32.mrf.mxu0 }
  0xbb   :  { %171 = vxpose.xlu0.b32.cont [8/16] %v137_v7, 128 }
  0xbd   :  { %606 = vperm.xlu1 %1275, %v1138_v8  }
  0xc1   :  { %911 = vperm.xlu2 %1276, %v1216_v15  }
  0xc2   :  { %v140_v10 = vpop.f32.mrf.mxu0 }
  0xc3   :  { %172 = vxpose.xlu0.b32.cont [9/16] %v140_v10, 128 }
  0xc5   :  { %906 = vperm.xlu1 %1275, %v1215_v11  }
  0xc9   :  { %901 = vperm.xlu2 %1276, %v1214_v18  }
  0xca   :  { %v143_v13 = vpop.f32.mrf.mxu0 }
  0xcb   :  { %173 = vxpose.xlu0.b32.cont [10/16] %v143_v13, 128 }
  0xcd   :  { %896 = vperm.xlu1 %1275, %v1213_v14  }
  0xd1   :  { %891 = vperm.xlu2 %1276, %v1212_v21  }
  0xd2   :  { %v146_v16 = vpop.f32.mrf.mxu0 }
  0xd3   :  { %174 = vxpose.xlu0.b32.cont [11/16] %v146_v16, 128 }
  0xd5   :  { %886 = vperm.xlu1 %1275, %v1211_v17  }
  0xd9   :  { %881 = vperm.xlu2 %1276, %v1210_v24  }
  0xda   :  { %v149_v19 = vpop.f32.mrf.mxu0 }
  0xdb   :  { %175 = vxpose.xlu0.b32.cont [12/16] %v149_v19, 128 }
  0xdd   :  { %876 = vperm.xlu1 %1275, %v1209_v20  }
  0xe1   :  { %871 = vperm.xlu2 %1276, %v1208_v29  }
  0xe2   :  { %v152_v22 = vpop.f32.mrf.mxu0 }
  0xe3   :  { %176 = vxpose.xlu0.b32.cont [13/16] %v152_v22, 128 }
  0xe5   :  { %866 = vperm.xlu1 %1275, %v1207_v23  }
  0xe9   :  { %861 = vperm.xlu2 %1276, %v1206_v34  }
  0xea   :  { %v155_v27 = vpop.f32.mrf.mxu0 }
  0xeb   :  { %177 = vxpose.xlu0.b32.cont [14/16] %v155_v27, 128 }
  0xed   :  { %856 = vperm.xlu1 %1275, %v1205_v28  }
  0xf1   :  { %851 = vperm.xlu2 %1276, %v1204_v37  }
  0xf2   :  { %v158_v31 = vpop.f32.mrf.mxu0 }
  0xf3   :  { %178 = vxpose.xlu0.b32.cont [15/16] %v158_v31, 128 }
  0xf5   :  { %841 = vperm.xlu1 %1275, %v1202_v33  }
  0xf9   :  { %836 = vperm.xlu2 %1276, %v1201_v41  }
  0xfa   :  { %v161_v35 = vpop.f32.mrf.mxu0 }
  0xfb   :  { %179 = vxpose.xlu0.b32.end [16/16] %v161_v35, 128 }
 0x127   :  { %v180_v48 = vpop.trf.xlu0 }
 0x128   :  { %v292_v50 = vadd.f32 %v215_v49, %v180_v48  ;;  %v442_v48 = vpop.permute.xlu2 %441 }
 0x12a   :  { %v308_v54 = vmax.f32 %v292_v50, 0.0 }
 0x12f   :  { %v181_v52 = vpop.trf.xlu0 }
 0x130   :  { %v293_v53 = vadd.f32 %v220_v51, %v181_v52  ;;  %v432_v50 = vpop.permute.xlu2 %431  ;;  %v1254_v51 = vld [vmem:[%s1728_s3 + $0x28] sm:$0xff] }
 0x132   :  { %v309_v55 = vmax.f32 %v293_v53, 0.0 }
 0x134   :  { %v340_v56 = vpack.c.bf16 %v309_v55, %v308_v54  ;;  %v1255_v55 = vld [vmem:[%s1728_s3 + $0x30] sm:$0xff] }
 0x137   :  { %v182_v57 = vpop.trf.xlu0 }
 0x138   :  { %v294_v58 = vadd.f32 %v225_v46, %v182_v57  ;;  %v1253_v46 = vld [vmem:[%s1728_s3 + $0x20] sm:$0xff]  ;;  %v422_v53 = vpop.permute.xlu2 %421 }
 0x13a   :  { %v310_v61 = vmax.f32 %v294_v58, 0.0 }
 0x13f   :  { %v183_v59 = vpop.trf.xlu0 }
 0x140   :  { %v295_v60 = vadd.f32 %v230_v47, %v183_v59  ;;  %v437_v47 = vpop.permute.xlu1 %436  ;;  %v1256_v59 = vld [vmem:[%s1728_s3 + $0x38] sm:$0xff] }
 0x142   :  { %v311_v62 = vmax.f32 %v295_v60, 0.0 }
 0x144   :  { %v341_v63 = vpack.c.bf16 %v311_v62, %v310_v61 }
 0x147   :  { %v184_v0 = vpop.trf.xlu0 }
 0x148   :  { %v296_v1 = vadd.f32 %v235_v44, %v184_v0  ;;  %v427_v49 = vpop.permute.xlu1 %426 }
 0x14a   :  { %v312_v5 = vmax.f32 %v296_v1, 0.0 }
 0x14f   :  { %v185_v2 = vpop.trf.xlu0 }
 0x150   :  { %v297_v3 = vadd.f32 %v240_v45, %v185_v2  ;;  %v417_v52 = vpop.permute.xlu1 %416 }
 0x152   :  { %v313_v6 = vmax.f32 %v297_v3, 0.0 }
 0x154   :  { %v342_v7 = vpack.c.bf16 %v313_v6, %v312_v5 }
 0x157   :  { %v186_v8 = vpop.trf.xlu0 }
 0x158   :  { %v298_v9 = vadd.f32 %v245_v42, %v186_v8  ;;  %v1638_v54 = vpop.permute.xlu1 %406 }
 0x15a   :  { %v314_v12 = vmax.f32 %v298_v9, 0.0 }
 0x15f   :  { %v187_v10 = vpop.trf.xlu0 }
 0x160   :  { %v299_v11 = vadd.f32 %v250_v43, %v187_v10  ;;  %v397_v57 = vpop.permute.xlu1 %396 }
 0x162   :  { %v315_v13 = vmax.f32 %v299_v11, 0.0  ;;  %1277 = vset.pattern.permute.xlu0 %v1304_v4 }
 0x164   :  { %v343_v14 = vpack.c.bf16 %v315_v13, %v314_v12 }
 0x167   :  { %v188_v15 = vpop.trf.xlu0 }
 0x168   :  { %v387_v60 = vpop.permute.xlu1 %386 }
 0x16f   :  { %v189_v16 = vpop.trf.xlu0 }
 0x170   :  { %v301_v41 = vadd.f32 %v260_v40, %v189_v16  ;;  %v1252_v40 = vld [vmem:[%s1728_s3 + $0x18] sm:$0xff]  ;;  %v377_v62 = vpop.permute.xlu1 %376 }
 0x177   :  { %v190_v17 = vpop.trf.xlu0 }
 0x178   :  { %v302_v35 = vadd.f32 %v1604_v36, %v190_v17  ;;  %v1249_v36 = vld [vmem:[%s1728_s3] sm:$0xff]  ;;  %v367_v1 = vpop.permute.xlu1 %366 }
 0x17a   :  { %v318_v44 = vmax.f32 %v302_v35, 0.0 }
 0x17f   :  { %v191_v18 = vpop.trf.xlu0 }
 0x180   :  { %v303_v33 = vadd.f32 %v270_v38, %v191_v18  ;;  %v1250_v38 = vld [vmem:[%s1728_s3 + $0x8] sm:$0xff] }
 0x182   :  { %v319_v42 = vmax.f32 %v303_v33, 0.0 }
 0x187   :  { %v192_v19 = vpop.trf.xlu0 }
 0x188   :  { %v304_v28 = vadd.f32 %v1588_v26, %v192_v19 }
 0x18a   :  { %v320_v37 = vmax.f32 %v304_v28, 0.0 }
 0x18f   :  { %v193_v20 = vpop.trf.xlu0 }
 0x190   :  { %v305_v24 = vadd.f32 %v280_v32, %v193_v20  ;;  %v317_v32 = vmax.f32 %v301_v41, 0.0 }
 0x192   :  { %v321_v4 = vmax.f32 %v305_v24, 0.0 }
 0x194   :  { %v346_v43 = vpack.c.bf16 %v321_v4, %v320_v37 }
 0x197   :  { %v194_v21 = vpop.trf.xlu0 }
 0x198   :  { %v306_v22 = vadd.f32 %v1586_v25, %v194_v21  ;;  %v300_v25 = vadd.f32 %v1609_v39, %v188_v15  ;;  %v1251_v39 = vld [vmem:[%s1728_s3 + $0x10] sm:$0xff] }
 0x19a   :  { %v322_v29 = vmax.f32 %v306_v22, 0.0  ;;  %v316_v45 = vmax.f32 %v300_v25, 0.0 }
 0x19c   :  { %v344_v26 = vpack.c.bf16 %v317_v32, %v316_v45 }
 0x19f   :  { %v195_v23 = vpop.trf.xlu0 }
 0x1a0   :  { %v307_v27 = vadd.f32 %v1596_v30, %v195_v23  ;;  %v345_v30 = vpack.c.bf16 %v319_v42, %v318_v44 }
 0x1a2   :  { %v323_v31 = vmax.f32 %v307_v27, 0.0 }
 0x1a4   :  { %v347_v34 = vpack.c.bf16 %v323_v31, %v322_v29 }
 0x1a6   :  { %492 = vmatpush.bf16.msra.mxu1 %v347_v34 }
 0x1aa   :  { %493 = vmatpush.bf16.msra.mxu1 %v346_v43 }
 0x1ae   :  { %494 = vmatpush.bf16.msra.mxu1 %v345_v30 }
 0x1b2   :  { %495 = vmatpush.bf16.msra.mxu1 %v344_v26 }
 0x1b6   :  { %496 = vmatpush.bf16.msra.mxu1 %v343_v14 }
 0x1ba   :  { %497 = vmatpush.bf16.msra.mxu1 %v342_v7 }
 0x1be   :  { %498 = vmatpush.bf16.msra.mxu1 %v341_v63 }
 0x1c2   :  { %499 = vmatpush.bf16.msra.mxu1 %v340_v56  ;;  %v412_v56 = vpop.permute.xlu2 %411 }
 0x1c5   :  { %500 = vmatmul.bf16.vlgmr.msra.gmra.mxu1 %v1249_v36 }
 0x1ca   :  { %v402_v58 = vpop.permute.xlu2 %401 }
 0x1d2   :  { %v392_v61 = vpop.permute.xlu2 %391 }
 0x1d5   :  { %505 = vmatmul.bf16.gmra.mxu1 %v1250_v38 }
 0x1da   :  { %v382_v63 = vpop.permute.xlu2 %381 }
 0x1e2   :  { %v372_v3 = vpop.permute.xlu2 %371 }
 0x1e5   :  { %510 = vmatmul.bf16.gmra.mxu1 %v1251_v39 }
 0x1f5   :  { %515 = vmatmul.bf16.gmra.mxu1 %v1252_v40 }
 0x205   :  { %520 = vmatmul.bf16.gmra.mxu1 %v1253_v46 }
 0x215   :  { %525 = vmatmul.bf16.gmra.mxu1 %v1254_v51 }
 0x225   :  { %530 = vmatmul.bf16.gmra.mxu1 %v1255_v55 }
 0x235   :  { %535 = vmatmul.bf16.gmra.mxu1 %v1256_v59 }
 0x242   :  { %v501_v0 = vpop.f32.mrf.mxu1 }
 0x243   :  { %v502_v2 = vadd.f32 %v501_v0, %v367_v1  ;;  %v1262_v0 = vld [vmem:[%s1728_s3 + $0x68] sm:$0xff]  ;;  %v1667_v1 = vpop.permute.xlu2 %661 }
 0x245   :  { %v541_v7 = vmax.f32 %v502_v2, 0.0 }
 0x24a   :  { %v503_v5 = vpop.f32.mrf.mxu1 }
 0x24b   :  { %v504_v6 = vadd.f32 %v503_v5, %v372_v3  ;;  %v1151_v3 = vld [vmem:[%s1729_s4 + $0xf0] sm:$0xff] }
 0x24c   :  { %671 = vperm.xlu0 %1277, %v1151_v3   ;;  %v1203_v5 = vld [vmem:[%s1729_s4 + $0x110] sm:$0xff] }
 0x24d   :  { %v542_v8 = vmax.f32 %v504_v6, 0.0  ;;  %v1675_v6 = vpop.permute.xlu2 %651 }
 0x24f   :  { %v574_v9 = vpack.c.bf16 %v542_v8, %v541_v7  ;;  %v1263_v8 = vld [vmem:[%s1728_s3 + $0x70] sm:$0xff] }
 0x252   :  { %v506_v10 = vpop.f32.mrf.mxu1 }
 0x253   :  { %v507_v11 = vadd.f32 %v506_v10, %v377_v62 }
 0x254   :  { %846 = vperm.xlu0 %1277, %v1203_v5  }
 0x255   :  { %v543_v14 = vmax.f32 %v507_v11, 0.0  ;;  %v1028_v11 = vld [vmem:[#allocation2] sm:$0x1] }
 0x25a   :  { %v508_v12 = vpop.f32.mrf.mxu1 }
 0x25b   :  { %v509_v13 = vadd.f32 %v508_v12, %v382_v63  ;;  %v1662_v63 = vpop.permute.xlu1 %676 }
 0x25c   :  { %1031 = vperm.xlu0 %1277, %v1028_v11  }
 0x25d   :  { %v544_v15 = vmax.f32 %v509_v13, 0.0  ;;  %v1264_v13 = vld [vmem:[%s1728_s3 + $0x78] sm:$0xff] }
 0x25f   :  { %v575_v16 = vpack.c.bf16 %v544_v15, %v543_v14 }
 0x262   :  { %v511_v17 = vpop.f32.mrf.mxu1 }
 0x263   :  { %v512_v18 = vadd.f32 %v511_v17, %v387_v60  ;;  %v667_v2 = vpop.permute.xlu1 %666 }
 0x265   :  { %v545_v21 = vmax.f32 %v512_v18, 0.0 }
 0x26a   :  { %v513_v19 = vpop.f32.mrf.mxu1 }
 0x26b   :  { %v514_v20 = vadd.f32 %v513_v19, %v392_v61  ;;  %v657_v7 = vpop.permute.xlu1 %656 }
 0x26d   :  { %v546_v22 = vmax.f32 %v514_v20, 0.0 }
 0x26f   :  { %v576_v23 = vpack.c.bf16 %v546_v22, %v545_v21 }
 0x272   :  { %v516_v24 = vpop.f32.mrf.mxu1 }
 0x273   :  { %v517_v27 = vadd.f32 %v516_v24, %v397_v57  ;;  %v647_v10 = vpop.permute.xlu1 %646 }
 0x275   :  { %v547_v31 = vmax.f32 %v517_v27, 0.0 }
 0x27a   :  { %v518_v28 = vpop.f32.mrf.mxu1 }
 0x27b   :  { %v519_v29 = vadd.f32 %v518_v28, %v402_v58  ;;  %v637_v14 = vpop.permute.xlu1 %636 }
 0x27d   :  { %v548_v33 = vmax.f32 %v519_v29, 0.0 }
 0x27f   :  { %v577_v4 = vpack.c.bf16 %v548_v33, %v547_v31 }
 0x282   :  { %v521_v34 = vpop.f32.mrf.mxu1 }
 0x283   :  { %v522_v60 = vadd.f32 %v521_v34, %v1638_v54  ;;  %v1260_v54 = vld [vmem:[%s1728_s3 + $0x58] sm:$0xff] }
 0x28a   :  { %v523_v35 = vpop.f32.mrf.mxu1 }
 0x28b   :  { %v524_v57 = vadd.f32 %v523_v35, %v412_v56  ;;  %v1261_v56 = vld [vmem:[%s1728_s3 + $0x60] sm:$0xff] }
 0x292   :  { %v526_v37 = vpop.f32.mrf.mxu1 }
 0x293   :  { %v527_v51 = vadd.f32 %v526_v37, %v417_v52  ;;  %v1258_v52 = vld [vmem:[%s1728_s3 + $0x48] sm:$0xff] }
 0x295   :  { %v551_v61 = vmax.f32 %v527_v51, 0.0 }
 0x29a   :  { %v528_v41 = vpop.f32.mrf.mxu1 }
 0x29b   :  { %v529_v39 = vadd.f32 %v528_v41, %v422_v53  ;;  %v1259_v53 = vld [vmem:[%s1728_s3 + $0x50] sm:$0xff] }
 0x29d   :  { %v552_v58 = vmax.f32 %v529_v39, 0.0 }
 0x29f   :  { %v579_v62 = vpack.c.bf16 %v552_v58, %v551_v61 }
 0x2a2   :  { %v531_v42 = vpop.f32.mrf.mxu1 }
 0x2a3   :  { %v532_v26 = vadd.f32 %v531_v42, %v427_v49  ;;  %v1257_v49 = vld [vmem:[%s1728_s3 + $0x40] sm:$0xff] }
 0x2a5   :  { %v553_v55 = vmax.f32 %v532_v26, 0.0 }
 0x2aa   :  { %v533_v43 = vpop.f32.mrf.mxu1 }
 0x2ab   :  { %v534_v30 = vadd.f32 %v533_v43, %v432_v50  ;;  %v549_v50 = vmax.f32 %v522_v60, 0.0 }
 0x2ad   :  { %v554_v40 = vmax.f32 %v534_v30, 0.0 }
 0x2af   :  { %v580_v59 = vpack.c.bf16 %v554_v40, %v553_v55 }
 0x2b2   :  { %v536_v25 = vpop.f32.mrf.mxu1 }
 0x2b3   :  { %v537_v44 = vadd.f32 %v536_v25, %v437_v47  ;;  %v550_v47 = vmax.f32 %v524_v57, 0.0 }
 0x2b5   :  { %v555_v36 = vmax.f32 %v537_v44, 0.0 }
 0x2ba   :  { %v538_v32 = vpop.f32.mrf.mxu1 }
 0x2bb   :  { %v539_v45 = vadd.f32 %v538_v32, %v442_v48  ;;  %v578_v48 = vpack.c.bf16 %v550_v47, %v549_v50 }
 0x2bd   :  { %v556_v38 = vmax.f32 %v539_v45, 0.0 }
 0x2bf   :  { %v581_v46 = vpack.c.bf16 %v556_v38, %v555_v36 }
 0x2c1   :  { %727 = vmatpush.bf16.msra.mxu2 %v581_v46 }
 0x2c5   :  { %728 = vmatpush.bf16.msra.mxu2 %v580_v59 }
 0x2c9   :  { %729 = vmatpush.bf16.msra.mxu2 %v579_v62  ;;  %v672_v62 = vpop.permute.xlu0 %671 }
 0x2cd   :  { %730 = vmatpush.bf16.msra.mxu2 %v578_v48 }
 0x2d1   :  { %731 = vmatpush.bf16.msra.mxu2 %v577_v4 }
 0x2d5   :  { %732 = vmatpush.bf16.msra.mxu2 %v576_v23 }
 0x2d9   :  { %733 = vmatpush.bf16.msra.mxu2 %v575_v16  ;;  %v627_v16 = vpop.permute.xlu1 %626 }
 0x2dd   :  { %734 = vmatpush.bf16.msra.mxu2 %v574_v9  ;;  %v1680_v9 = vpop.permute.xlu2 %641 }
 0x2e0   :  { %735 = vmatmul.bf16.vlgmr.msra.gmra.mxu2 %v1257_v49 }
 0x2e1   :  { %v617_v18 = vpop.permute.xlu1 %616 }
 0x2e5   :  { %v632_v12 = vpop.permute.xlu2 %631 }
 0x2e9   :  { %v607_v22 = vpop.permute.xlu1 %606 }
 0x2ed   :  { %v622_v15 = vpop.permute.xlu2 %621 }
 0x2f0   :  { %740 = vmatmul.bf16.gmra.mxu2 %v1258_v52 }
 0x2f5   :  { %v612_v17 = vpop.permute.xlu2 %611 }
 0x2fd   :  { %v602_v20 = vpop.permute.xlu2 %601 }
 0x300   :  { %745 = vmatmul.bf16.gmra.mxu2 %v1259_v53 }
 0x310   :  { %750 = vmatmul.bf16.gmra.mxu2 %v1260_v54 }
 0x320   :  { %755 = vmatmul.bf16.gmra.mxu2 %v1261_v56 }
 0x330   :  { %760 = vmatmul.bf16.gmra.mxu2 %v1262_v0 }
 0x340   :  { %765 = vmatmul.bf16.gmra.mxu2 %v1263_v8 }
 0x350   :  { %770 = vmatmul.bf16.gmra.mxu2 %v1264_v13 }
 0x363   :  { %v736_v19 = vpop.f32.mrf.mxu2 }
 0x364   :  { %v737_v21 = vadd.f32 %v736_v19, %v602_v20  ;;  %v1270_v19 = vld [vmem:[%s1728_s3 + $0xa8] sm:$0xff]  ;;  %v1271_v20 = vld [vmem:[%s1728_s3 + $0xb0] sm:$0xff] }
 0x366   :  { %v776_v27 = vmax.f32 %v737_v21, 0.0  ;;  %v1272_v21 = vld [vmem:[%s1728_s3 + $0xb8] sm:$0xff] }
 0x36b   :  { %v738_v23 = vpop.f32.mrf.mxu2 }
 0x36c   :  { %v739_v24 = vadd.f32 %v738_v23, %v607_v22 }
 0x36e   :  { %v777_v28 = vmax.f32 %v739_v24, 0.0 }
 0x370   :  { %v809_v29 = vpack.c.bf16 %v777_v28, %v776_v27 }
 0x373   :  { %v741_v31 = vpop.f32.mrf.mxu2 }
 0x374   :  { %v742_v33 = vadd.f32 %v741_v31, %v612_v17 }
 0x376   :  { %v778_v35 = vmax.f32 %v742_v33, 0.0 }
 0x37b   :  { %v743_v4 = vpop.f32.mrf.mxu2 }
 0x37c   :  { %v744_v34 = vadd.f32 %v743_v4, %v617_v18  ;;  %v1269_v18 = vld [vmem:[%s1728_s3 + $0xa0] sm:$0xff] }
 0x37e   :  { %v779_v37 = vmax.f32 %v744_v34, 0.0 }
 0x380   :  { %v810_v41 = vpack.c.bf16 %v779_v37, %v778_v35  ;;  %v912_v35 = vpop.permute.xlu2 %911 }
 0x383   :  { %v746_v42 = vpop.f32.mrf.mxu2 }
 0x384   :  { %v747_v43 = vadd.f32 %v746_v42, %v622_v15 }
 0x386   :  { %v780_v32 = vmax.f32 %v747_v43, 0.0 }
 0x388   :  { %v902_v42 = vpop.permute.xlu2 %901 }
 0x38b   :  { %v748_v25 = vpop.f32.mrf.mxu2 }
 0x38c   :  { %v749_v44 = vadd.f32 %v748_v25, %v627_v16 }
 0x38e   :  { %v781_v30 = vmax.f32 %v749_v44, 0.0 }
 0x390   :  { %v811_v45 = vpack.c.bf16 %v781_v30, %v780_v32  ;;  %v892_v32 = vpop.permute.xlu2 %891 }
 0x393   :  { %v751_v26 = vpop.f32.mrf.mxu2 }
 0x394   :  { %v752_v36 = vadd.f32 %v751_v26, %v632_v12 }
 0x396   :  { %v782_v40 = vmax.f32 %v752_v36, 0.0 }
 0x398   :  { %v882_v26 = vpop.permute.xlu2 %881 }
 0x39b   :  { %v753_v38 = vpop.f32.mrf.mxu2 }
 0x39c   :  { %v754_v39 = vadd.f32 %v753_v38, %v637_v14 }
 0x39e   :  { %v783_v46 = vmax.f32 %v754_v39, 0.0 }
 0x3a0   :  { %v812_v51 = vpack.c.bf16 %v783_v46, %v782_v40  ;;  %v872_v39 = vpop.permute.xlu2 %871 }
 0x3a3   :  { %v756_v55 = vpop.f32.mrf.mxu2 }
 0x3a4   :  { %v757_v15 = vadd.f32 %v756_v55, %v1680_v9  ;;  %v1267_v9 = vld [vmem:[%s1728_s3 + $0x90] sm:$0xff] }
 0x3a6   :  { %v784_v17 = vmax.f32 %v757_v15, 0.0 }
 0x3ab   :  { %v758_v57 = vpop.f32.mrf.mxu2 }
 0x3ac   :  { %v759_v12 = vadd.f32 %v758_v57, %v647_v10  ;;  %v1268_v10 = vld [vmem:[%s1728_s3 + $0x98] sm:$0xff] }
 0x3b3   :  { %v761_v58 = vpop.f32.mrf.mxu2 }
 0x3b4   :  { %v762_v8 = vadd.f32 %v761_v58, %v1675_v6  ;;  %v1265_v6 = vld [vmem:[%s1728_s3 + $0x80] sm:$0xff] }
 0x3b6   :  { %v786_v16 = vmax.f32 %v762_v8, 0.0 }
 0x3bb   :  { %v763_v59 = vpop.f32.mrf.mxu2 }
 0x3bc   :  { %v764_v0 = vadd.f32 %v763_v59, %v657_v7  ;;  %v1266_v7 = vld [vmem:[%s1728_s3 + $0x88] sm:$0xff] }
 0x3be   :  { %v787_v13 = vmax.f32 %v764_v0, 0.0 }
 0x3c3   :  { %v766_v60 = vpop.f32.mrf.mxu2 }
 0x3c4   :  { %v767_v53 = vadd.f32 %v766_v60, %v1667_v1 }
 0x3c6   :  { %v788_v11 = vmax.f32 %v767_v53, 0.0 }
 0x3cb   :  { %v768_v61 = vpop.f32.mrf.mxu2 }
 0x3cc   :  { %v769_v49 = vadd.f32 %v768_v61, %v667_v2  ;;  %v785_v2 = vmax.f32 %v759_v12, 0.0 }
 0x3ce   :  { %v789_v3 = vmax.f32 %v769_v49, 0.0  ;;  %v813_v1 = vpack.c.bf16 %v785_v2, %v784_v17 }
 0x3d0   :  { %v815_v14 = vpack.c.bf16 %v789_v3, %v788_v11 }
 0x3d3   :  { %v771_v47 = vpop.f32.mrf.mxu2 }
 0x3d4   :  { %v772_v50 = vadd.f32 %v771_v47, %v672_v62  ;;  %v862_v62 = vpop.permute.xlu2 %861 }
 0x3d6   :  { %v790_v54 = vmax.f32 %v772_v50, 0.0 }
 0x3db   :  { %v773_v48 = vpop.f32.mrf.mxu2 }
 0x3dc   :  { %v774_v52 = vadd.f32 %v773_v48, %v1662_v63  ;;  %v814_v63 = vpack.c.bf16 %v787_v13, %v786_v16  ;;  %v852_v11 = vpop.permute.xlu2 %851 }
 0x3de   :  { %v791_v56 = vmax.f32 %v774_v52, 0.0 }
 0x3e0   :  { %v816_v5 = vpack.c.bf16 %v791_v56, %v790_v54 }
 0x3e2   :  { %962 = vmatpush.bf16.msra.mxu3 %v816_v5 }
 0x3e6   :  { %963 = vmatpush.bf16.msra.mxu3 %v815_v14 }
 0x3ea   :  { %964 = vmatpush.bf16.msra.mxu3 %v814_v63  ;;  %v847_v63 = vpop.permute.xlu0 %846 }
 0x3ee   :  { %965 = vmatpush.bf16.msra.mxu3 %v813_v1 }
 0x3f2   :  { %966 = vmatpush.bf16.msra.mxu3 %v812_v51 }
 0x3f6   :  { %967 = vmatpush.bf16.msra.mxu3 %v811_v45 }
 0x3fa   :  { %968 = vmatpush.bf16.msra.mxu3 %v810_v41  ;;  %v907_v41 = vpop.permute.xlu1 %906 }
 0x3fe   :  { %969 = vmatpush.bf16.msra.mxu3 %v809_v29 }
 0x401   :  { %970 = vmatmul.bf16.vlgmr.msra.gmra.mxu3 %v1265_v6 }
 0x402   :  { %v897_v25 = vpop.permute.xlu1 %896 }
 0x40a   :  { %v887_v45 = vpop.permute.xlu1 %886 }
 0x411   :  { %975 = vmatmul.bf16.gmra.mxu3 %v1266_v7 }
 0x412   :  { %v877_v38 = vpop.permute.xlu1 %876 }
 0x41a   :  { %v867_v60 = vpop.permute.xlu1 %866 }
 0x421   :  { %980 = vmatmul.bf16.gmra.mxu3 %v1267_v9 }
 0x422   :  { %v857_v3 = vpop.permute.xlu1 %856 }
 0x42a   :  { %v842_v6 = vpop.permute.xlu1 %841 }
 0x431   :  { %985 = vmatmul.bf16.gmra.mxu3 %v1268_v10  ;;  %v837_v10 = vpop.permute.xlu2 %836 }
 0x441   :  { %990 = vmatmul.bf16.gmra.mxu3 %v1269_v18 }
 0x451   :  { %995 = vmatmul.bf16.gmra.mxu3 %v1270_v19 }
 0x461   :  { %1000 = vmatmul.bf16.gmra.mxu3 %v1271_v20 }
 0x471   :  { %1005 = vmatmul.bf16.gmra.mxu3 %v1272_v21 }
 0x484   :  { %v1713_v22 = vpop.f32.mrf.mxu3 }
 0x485   :  { %v972_v18 = vadd.f32 %v1713_v22, %v837_v10 }
 0x487   :  { %v1011_v21 = vmax.f32 %v972_v18, 0.0 }
 0x48c   :  { %v1715_v23 = vpop.f32.mrf.mxu3 }
 0x48d   :  { %v974_v7 = vadd.f32 %v1715_v23, %v842_v6 }
 0x48f   :  { %v1012_v20 = vmax.f32 %v974_v7, 0.0 }
 0x494   :  { %v976_v24 = vpop.f32.mrf.mxu3 }
 0x495   :  { %v977_v17 = vadd.f32 %v976_v24, %v847_v63  ;;  %v1027_v24 = vld [vmem:[%s1730_s5] sm:$0x1] }
 0x497   :  { %v1013_v19 = vmax.f32 %v977_v17, 0.0 }
 0x49c   :  { %v978_v27 = vpop.f32.mrf.mxu3 }
 0x49d   :  { %v979_v16 = vadd.f32 %v978_v27, %v852_v11  ;;  %v1032_v27 = vpop.permute.xlu0 %1031 }
 0x49e   :  { %v1034_v22 = vperm.slane %v1032_v27, 0 }
 0x49f   :  { %v1014_v9 = vmax.f32 %v979_v16, 0.0 }
 0x4a4   :  { %v981_v28 = vpop.f32.mrf.mxu3 }
 0x4a5   :  { %v982_v14 = vadd.f32 %v981_v28, %v857_v3 }
 0x4a7   :  { %v1015_v1 = vmax.f32 %v982_v14, 0.0 }
 0x4ac   :  { %v983_v29 = vpop.f32.mrf.mxu3 }
 0x4ad   :  { %v984_v12 = vadd.f32 %v983_v29, %v862_v62 }
 0x4af   :  { %v1016_v2 = vmax.f32 %v984_v12, 0.0 }
 0x4b4   :  { %v986_v31 = vpop.f32.mrf.mxu3 }
 0x4b5   :  { %v987_v5 = vadd.f32 %v986_v31, %v867_v60 }
 0x4b7   :  { %v1017_v15 = vmax.f32 %v987_v5, 0.0 }
 0x4bc   :  { %v988_v33 = vpop.f32.mrf.mxu3 }
 0x4bd   :  { %v989_v56 = vadd.f32 %v988_v33, %v872_v39 }
 0x4bf   :  { %v1018_v13 = vmax.f32 %v989_v56, 0.0 }
 0x4c4   :  { %v991_v4 = vpop.f32.mrf.mxu3 }
 0x4c5   :  { %v992_v53 = vadd.f32 %v991_v4, %v877_v38 }
 0x4c7   :  { %v1019_v8 = vmax.f32 %v992_v53, 0.0 }
 0x4cc   :  { %v993_v34 = vpop.f32.mrf.mxu3 }
 0x4cd   :  { %v994_v49 = vadd.f32 %v993_v34, %v882_v26 }
 0x4cf   :  { %v1020_v0 = vmax.f32 %v994_v49, 0.0 }
 0x4d4   :  { %v996_v37 = vpop.f32.mrf.mxu3 }
 0x4d5   :  { %v997_v50 = vadd.f32 %v996_v37, %v887_v45 }
 0x4d7   :  { %v1021_v54 = vmax.f32 %v997_v50, 0.0 }
 0x4dc   :  { %v998_v43 = vpop.f32.mrf.mxu3 }
 0x4dd   :  { %v999_v61 = vadd.f32 %v998_v43, %v892_v32 }
 0x4df   :  { %v1022_v52 = vmax.f32 %v999_v61, 0.0 }
 0x4e4   :  { %v1001_v44 = vpop.f32.mrf.mxu3 }
 0x4e5   :  { %v1002_v58 = vadd.f32 %v1001_v44, %v897_v25 }
 0x4e7   :  { %v1023_v48 = vmax.f32 %v1002_v58, 0.0 }
 0x4ec   :  { %v1003_v30 = vpop.f32.mrf.mxu3 }
 0x4ed   :  { %v1004_v55 = vadd.f32 %v1003_v30, %v902_v42 }
 0x4ef   :  { %v1024_v47 = vmax.f32 %v1004_v55, 0.0 }
 0x4f4   :  { %v1006_v36 = vpop.f32.mrf.mxu3 }
 0x4f5   :  { %v1007_v46 = vadd.f32 %v1006_v36, %v907_v41 }
 0x4f7   :  { %v1025_v59 = vmax.f32 %v1007_v46, 0.0 }
 0x4fc   :  { %v1008_v40 = vpop.f32.mrf.mxu3 }
 0x4fd   :  { %v1009_v51 = vadd.f32 %v1008_v40, %v912_v35 }
 0x4ff   :  { %v1026_v57 = vmax.f32 %v1009_v51, 0.0 }
 0x501   :  { %1035 = vmatpush.msrb.mxu0 %v1026_v57 }
 0x503   :  { %1036 = vmatpush.msrb.mxu0 %v1025_v59 }
 0x505   :  { %1037 = vmatpush.msrb.mxu0 %v1024_v47 }
 0x507   :  { %1038 = vmatpush.msrb.mxu0 %v1023_v48 }
 0x509   :  { %1039 = vmatpush.msrb.mxu0 %v1022_v52 }
 0x50b   :  { %1040 = vmatpush.msrb.mxu0 %v1021_v54 }
 0x50d   :  { %1041 = vmatpush.msrb.mxu0 %v1020_v0 }
 0x50f   :  { %1042 = vmatpush.msrb.mxu0 %v1019_v8 }
 0x511   :  { %1043 = vmatpush.msrb.mxu0 %v1018_v13 }
 0x513   :  { %1044 = vmatpush.msrb.mxu0 %v1017_v15 }
 0x515   :  { %1045 = vmatpush.msrb.mxu0 %v1016_v2 }
 0x517   :  { %1046 = vmatpush.msrb.mxu0 %v1015_v1 }
 0x519   :  { %1047 = vmatpush.msrb.mxu0 %v1014_v9 }
 0x51b   :  { %1048 = vmatpush.msrb.mxu0 %v1013_v19 }
 0x51d   :  { %1049 = vmatpush.msrb.mxu0 %v1012_v20 }
 0x51f   :  { %1050 = vmatpush.msrb.mxu0 %v1011_v21 }
 0x520   :  { %1051 = vmatmul.f32.vlgmr.msrb.gmra.mxu0 %v1027_v24 }
 0x59d   :  { %v1052_v23 = vpop.f32.mrf.mxu0 }
 0x59e   :  { %v1053_v28 = vadd.f32 %v1052_v23, %v1034_v22 }
 0x5a0   :  { %1055 = vst [vmem:[#allocation3] sm:$0x1] %v1053_v28 }
 0x5a1   :  { %1066 = dma.vmem_to_hbm [thread:$0]  %s1062_s26, 16, %s1064_s29, [#allocation4]  }
 0x5a2   :  { %1302 = dma.done.wait [#allocation4], 16  }
 0x5a3   :  { %1303 = vsyncadd [#allocation4], 4294967280 }
 0x5a4   :  { %1071 = vsyncpa [#allocation4], 1 }

</bundles_post_ra>
